<compile_context>
chip_gen: v5e
topology: v5e:2x2
jax: 0.10.0
libtpu: 0.0.40
codegen_flags: <defaults>
</compile_context>

<pallas_src>
import jax
import jax.numpy as jnp
from jax.experimental import pallas as pl
from jax.experimental.pallas import tpu as pltpu


def _mlp_kernel(x_ref, w1t_ref, b1_ref, w2t_ref, b2_ref, o_ref):
    # x: (tb, D) bf16 | w1t: (D, H) bf16 | b1: (1, H) f32
    # w2t: (H, C_pad) bf16 | b2: (1, C_pad) f32 | o: (tb, C_pad) f32
    #
    # linear1: plain NN-form matmul (weights were pre-transposed in the
    # wrapper), f32 accumulation on the MXU.
    h = jnp.dot(x_ref[...], w1t_ref[...], preferred_element_type=jnp.float32)
    # bias + ReLU epilogue in f32 on the VPU (implicit (1,H)+(tb,H) broadcast).
    h = jnp.maximum(h + b1_ref[...], 0.0)
    # linear2: cast the hidden activations back to the weight dtype (bf16) so
    # the second matmul also runs on the native MXU path, accumulate in f32.
    # TODO(synk): for large H, stage `h` in an explicit pltpu.VMEM scratch
    # instead of relying on the register allocator (spill planning).
    out = jnp.dot(h.astype(w2t_ref.dtype), w2t_ref[...],
                  preferred_element_type=jnp.float32)
    o_ref[...] = (out + b2_ref[...]).astype(o_ref.dtype)


def _round_up(v, m):
    return ((v + m - 1) // m) * m


def _vmem_limit_bytes():
    """Generation-aware VMEM budget (~3/4 of physical, capped)."""
    try:
        cap = int(pltpu.get_tpu_info().vmem_capacity_bytes)
    except Exception:
        cap = 64 * 1024 * 1024  # conservative fallback: v7x per-TC VMEM
    return int(min(cap * 3 // 4, 100 * 1024 * 1024))


def _pick_batch_tile(B, D, H, C_pad, block_b, itemsize, vmem_limit):
    """Choose the batch row tile from the VMEM budget + grid-shape heuristics."""
    granule = 16 if itemsize < 4 else 8  # bf16 sublane packing -> multiples of 16

    # Budget model: single-buffered resident weights/biases + per-row streamed
    # state (double-buffered x tile, double-buffered f32 out tile, f32 hidden
    # plus its low-precision copy for the second matmul).
    resident = (D * H + H * C_pad) * itemsize + (H + C_pad) * 4
    per_row = (2 * D * itemsize
               + 2 * C_pad * 4
               + H * 4 + H * itemsize)
    budget = vmem_limit - resident - (4 << 20)  # slack for compiler scratch
    tb_budget = max(granule, (budget // per_row) // granule * granule)

    tb = max(granule, (min(block_b, tb_budget) // granule) * granule)

    if B <= tb:
        if B >= 2 * granule:
            # Small-but-splittable batch: >=2 grid steps so v7x's second
            # TensorCore gets work under dimension_semantics=("parallel",).
            tb = _round_up((B + 1) // 2, granule)
        else:
            # Tiny batch: one (padded) tile; nothing to shard.
            tb = _round_up(B, granule)
    elif B % tb != 0:
        # Prefer a tile that divides B (skips the wrapper-side pad of x, i.e.
        # one fewer HBM pass) as long as it stays >= tb // 2.
        for t in range(tb, max(granule, tb // 2) - 1, -granule):
            if B % t == 0:
                tb = t
                break
    return tb


def neural_net_forward(x, w1, b1, w2, b2, *, block_b=512,
                       compute_dtype=jnp.bfloat16):
    """Forward pass of NeuralNet: relu(x @ W1^T + b1) @ W2^T + b2."""
    B, D = x.shape
    H = w1.shape[0]
    C = w2.shape[0]
    assert w1.shape == (H, D)
    assert w2.shape[1] == H, "module requires hidden_size == input_size"

    itemsize = jnp.dtype(compute_dtype).itemsize
    vmem_limit = _vmem_limit_bytes()

    # --- lane-dense output: pad the class dim to a multiple of 128 lanes -----
    C_pad = max(128, _round_up(C, 128))
    if C_pad != C:
        w2 = jnp.pad(w2, ((0, C_pad - C), (0, 0)))
        b2 = jnp.pad(b2, ((0, 0), (0, C_pad - C)))

    # --- one-time wrapper-side prep: cast to bf16, transpose to NN form ------
    w1t = w1.T.astype(compute_dtype)                       # (D, H)
    w2t = w2.T.astype(compute_dtype)                       # (H, C_pad)
    b1 = b1.reshape(1, H).astype(jnp.float32)
    b2 = b2.reshape(1, C_pad).astype(jnp.float32)
    x_c = x.astype(compute_dtype)

    # --- batch tiling ---------------------------------------------------------
    tb = _pick_batch_tile(B, D, H, C_pad, block_b, itemsize, vmem_limit)
    B_pad = _round_up(B, tb)
    if B_pad != B:
        x_c = jnp.pad(x_c, ((0, B_pad - B), (0, 0)))
    grid = (B_pad // tb,)

    out = pl.pallas_call(
        _mlp_kernel,
        out_shape=jax.ShapeDtypeStruct((B_pad, C_pad), jnp.float32),
        grid_spec=pltpu.PrefetchScalarGridSpec(
            num_scalar_prefetch=0,
            grid=grid,
            in_specs=[
                # activations: streamed over the batch grid axis (default
                # double-buffering; bump to pl.Buffered(3) only if xprof shows
                # exposed DMA on this stream).
                pl.BlockSpec((tb, D), lambda i: (i, 0)),
                # weights / biases: constant index_map -> VMEM-resident, and
                # single-buffered so they don't pay 2x footprint on v7x.
                pl.BlockSpec((D, H), lambda i: (0, 0),
                             pipeline_mode=pl.Buffered(1)),
                pl.BlockSpec((1, H), lambda i: (0, 0),
                             pipeline_mode=pl.Buffered(1)),
                pl.BlockSpec((H, C_pad), lambda i: (0, 0),
                             pipeline_mode=pl.Buffered(1)),
                pl.BlockSpec((1, C_pad), lambda i: (0, 0),
                             pipeline_mode=pl.Buffered(1)),
            ],
            out_specs=pl.BlockSpec((tb, C_pad), lambda i: (i, 0)),
        ),
        compiler_params=pltpu.CompilerParams(
            # batch rows are independent -> shard across v7x's 2 TensorCores
            dimension_semantics=("parallel",),
            vmem_limit_bytes=vmem_limit,
        ),
    )(x_c, w1t, b1, w2t, b2)

    # strip batch padding and the lane padding on the class dim
    return out[:B, :C]


def neural_net_reference(x, w1, b1, w2, b2):
    h = jnp.maximum(x @ w1.T + b1, 0.0)
    return h @ w2.T + b2


if __name__ == "__main__":
    # Small shapes consistent with the module's forward:
    # hidden_size must equal input_size for linear2 to apply (see NOTE above).
    batch = 8
    input_size = 32
    hidden_size = 32   # == input_size (required by the reference module's forward)
    num_classes = 10

    key = jax.random.PRNGKey(0)
    kx, kw1, kb1, kw2, kb2 = jax.random.split(key, 5)

    # Deterministic parameter init (uniform like PyTorch's default Linear init).
    bound1 = 1.0 / jnp.sqrt(input_size)
    bound2 = 1.0 / jnp.sqrt(input_size)  # linear2 fan_in = input_size per __init__
    x = jax.random.normal(kx, (batch, input_size), dtype=jnp.float32)
    w1 = jax.random.uniform(kw1, (hidden_size, input_size), jnp.float32,
                            -bound1, bound1)
    b1 = jax.random.uniform(kb1, (1, hidden_size), jnp.float32, -bound1, bound1)
    w2 = jax.random.uniform(kw2, (num_classes, input_size), jnp.float32,
                            -bound2, bound2)
    b2 = jax.random.uniform(kb2, (1, num_classes), jnp.float32, -bound2, bound2)

    out = neural_net_forward(x, w1, b1, w2, b2)
    jax.block_until_ready(out)

    ref = neural_net_reference(x, w1, b1, w2, b2)
    assert out.shape == (batch, num_classes)
    # bf16 inputs / f32 accumulation -> loosened tolerance vs the pure-f32 ref.
    assert jnp.allclose(out, ref, atol=3e-2, rtol=3e-2), "mismatch vs reference"

    print("KERNEL_OK")
</pallas_src>

<mosaic_0001>
module attributes {stable_mosaic.version = 11 : i64} {
  func.func @_mlp_kernel(%arg0: i32, %arg1: memref<16x32xbf16, #tpu.memory_space<vmem>>, %arg2: memref<32x32xbf16, #tpu.memory_space<vmem>>, %arg3: memref<1x32xf32, #tpu.memory_space<vmem>>, %arg4: memref<32x128xbf16, #tpu.memory_space<vmem>>, %arg5: memref<1x128xf32, #tpu.memory_space<vmem>>, %arg6: memref<16x128xf32, #tpu.memory_space<vmem>>) attributes {dimension_semantics = [#tpu.dimension_semantics<parallel>], iteration_bounds = array<i64: 1>, scalar_prefetch = 0 : i64, scratch_operands = 0 : i64, tpu.core_type = #tpu.core_type<tc>, window_params = [{transform_indices = @transform_0, window_bounds = array<i64: 16, 32>}, {pipeline_mode = #tpu.pipeline_mode<synchronous>, transform_indices = @transform_1, window_bounds = array<i64: 32, 32>}, {pipeline_mode = #tpu.pipeline_mode<synchronous>, transform_indices = @transform_2, window_bounds = array<i64: 1, 32>}, {pipeline_mode = #tpu.pipeline_mode<synchronous>, transform_indices = @transform_3, window_bounds = array<i64: 32, 128>}, {pipeline_mode = #tpu.pipeline_mode<synchronous>, transform_indices = @transform_4, window_bounds = array<i64: 1, 128>}, {transform_indices = @transform_5, window_bounds = array<i64: 16, 128>}]} {
    %c0 = arith.constant 0 : index
    %c0_0 = arith.constant 0 : index
    %0 = vector.load %arg1[%c0, %c0_0] : memref<16x32xbf16, #tpu.memory_space<vmem>>, vector<16x32xbf16>
    %c0_1 = arith.constant 0 : index
    %c0_2 = arith.constant 0 : index
    %1 = vector.load %arg2[%c0_1, %c0_2] : memref<32x32xbf16, #tpu.memory_space<vmem>>, vector<32x32xbf16>
    %cst = arith.constant dense<0.000000e+00> : vector<16x32xf32>
    %2 = tpu.matmul %0, %1, %cst {dimension_numbers = #tpu.dot_dimension_numbers<[1], [0], [0], [1], [0, 0, 1, 1], [], []>} : vector<16x32xbf16>, vector<32x32xbf16>, vector<16x32xf32> -> vector<16x32xf32>
    %c0_3 = arith.constant 0 : index
    %c0_4 = arith.constant 0 : index
    %3 = vector.load %arg3[%c0_3, %c0_4] : memref<1x32xf32, #tpu.memory_space<vmem>>, vector<1x32xf32>
    %4 = vector.broadcast %3 : vector<1x32xf32> to vector<16x32xf32>
    %5 = arith.addf %2, %4 : vector<16x32xf32>
    %cst_5 = arith.constant 0.000000e+00 : f32
    %6 = vector.broadcast %cst_5 : f32 to vector<16x32xf32>
    %7 = arith.maximumf %5, %6 : vector<16x32xf32>
    %8 = arith.truncf %7 : vector<16x32xf32> to vector<16x32xbf16>
    %c0_6 = arith.constant 0 : index
    %c0_7 = arith.constant 0 : index
    %9 = vector.load %arg4[%c0_6, %c0_7] : memref<32x128xbf16, #tpu.memory_space<vmem>>, vector<32x128xbf16>
    %cst_8 = arith.constant dense<0.000000e+00> : vector<16x128xf32>
    %10 = tpu.matmul %8, %9, %cst_8 {dimension_numbers = #tpu.dot_dimension_numbers<[1], [0], [0], [1], [0, 0, 1, 1], [], []>} : vector<16x32xbf16>, vector<32x128xbf16>, vector<16x128xf32> -> vector<16x128xf32>
    %c0_9 = arith.constant 0 : index
    %c0_10 = arith.constant 0 : index
    %11 = vector.load %arg5[%c0_9, %c0_10] : memref<1x128xf32, #tpu.memory_space<vmem>>, vector<1x128xf32>
    %12 = vector.broadcast %11 : vector<1x128xf32> to vector<16x128xf32>
    %13 = arith.addf %10, %12 : vector<16x128xf32>
    %c0_11 = arith.constant 0 : index
    %c0_12 = arith.constant 0 : index
    %14 = vector.load %arg6[%c0_11, %c0_12] : memref<16x128xf32, #tpu.memory_space<vmem>>, vector<16x128xf32>
    tpu.vector_store %arg6[%c0_11, %c0_12], %13 {strides = array<i32>} : memref<16x128xf32, #tpu.memory_space<vmem>>, vector<16x128xf32>,
    return
  }
  func.func @transform_0(%arg0: i32) -> (i32, i32) {
    %c0_i32 = arith.constant 0 : i32
    %c0_i32_0 = arith.constant 0 : i32
    return %arg0, %c0_i32 : i32, i32
  }
  func.func @transform_1(%arg0: i32) -> (i32, i32) {
    %c0_i32 = arith.constant 0 : i32
    %c0_i32_0 = arith.constant 0 : i32
    %c0_i32_1 = arith.constant 0 : i32
    return %c0_i32, %c0_i32_0 : i32, i32
  }
  func.func @transform_2(%arg0: i32) -> (i32, i32) {
    %c0_i32 = arith.constant 0 : i32
    %c0_i32_0 = arith.constant 0 : i32
    %c0_i32_1 = arith.constant 0 : i32
    return %c0_i32, %c0_i32_0 : i32, i32
  }
  func.func @transform_3(%arg0: i32) -> (i32, i32) {
    %c0_i32 = arith.constant 0 : i32
    %c0_i32_0 = arith.constant 0 : i32
    %c0_i32_1 = arith.constant 0 : i32
    return %c0_i32, %c0_i32_0 : i32, i32
  }
  func.func @transform_4(%arg0: i32) -> (i32, i32) {
    %c0_i32 = arith.constant 0 : i32
    %c0_i32_0 = arith.constant 0 : i32
    %c0_i32_1 = arith.constant 0 : i32
    return %c0_i32, %c0_i32_0 : i32, i32
  }
  func.func @transform_5(%arg0: i32) -> (i32, i32) {
    %c0_i32 = arith.constant 0 : i32
    %c0_i32_0 = arith.constant 0 : i32
    return %arg0, %c0_i32 : i32, i32
  }
}

</mosaic_0001>

<bundles_post_ra>
// kernel: tpu_custom_call.1
= control target key start
LH: loop header
LB: loop body
LE: loop exit
PB: predicated region body
PF: predicated region fallthrough
CT: control target
= control target key end

     0   :  { %10 = vsyncpa [#allocation3], 0  ;;  %s371_s0 = inlined_call_operand.hbm [shape: bf16[16,32], index: 0, kind: input, shape index: {}]   ;;  %s372_s1 = inlined_call_operand.hbm [shape: bf16[32,32], index: 1, kind: input, shape index: {}]   ;;  %s373_s2 = inlined_call_operand.vmem [shape: f32[1,32], index: 2, kind: input, shape index: {}]   ;;  %s374_s3 = inlined_call_operand.hbm [shape: bf16[32,128], index: 3, kind: input, shape index: {}]   ;;  %s375_s4 = inlined_call_operand.vmem [shape: f32[1,128], index: 4, kind: input, shape index: {}]   ;;  %s376_s5 = inlined_call_operand.hbm [shape: f32[16,128], index: 5, kind: output, shape index: {}]  }
   0x1   :  { %11 = vsyncpa [#allocation6], 0 }
   0x2   :  { %12 = vsyncpa [#allocation4], 0  ;;  %s30_s20 = sshll.u32 %s372_s1, 4  ;;  %s315_s21 = smov [#allocation5]   ;;  %s31_s20 = int_to_ptr.hbm [resolvable:$true] %s30_s20 }
   0x3   :  { %s32_s22 = sshll.u32 %s315_s21, 4  ;;  %s17_s25 = sshll.u32 %s371_s0, 4  ;;  %s33_s22 = int_to_ptr.vmem [resolvable:$true] %s32_s22  ;;  %s18_s25 = int_to_ptr.hbm [resolvable:$true] %s17_s25 }
   0x4   :  { %s316_s26 = smov 64   ;;  %s317_s27 = smov 4  }
   0x5   :  { %38 = dma.hbm_to_vmem [thread:$0]  %s31_s20, 256, %s33_s22, [#allocation6], %s316_s26, %s316_s26, %s317_s27  }
   0x6   :  { %s318_s28 = smov [#allocation2]   ;;  %s45_s7 = sshll.u32 %s374_s3, 4  ;;  %s46_s7 = int_to_ptr.hbm [resolvable:$true] %s45_s7 }
   0x7   :  { %s19_s29 = sshll.u32 %s318_s28, 4  ;;  %s319_s1 = smov [#allocation7]   ;;  %s20_s29 = int_to_ptr.vmem [resolvable:$true] %s19_s29 }
   0x8   :  { %25 = dma.hbm_to_vmem [thread:$0]  %s18_s25, 128, %s20_s29, [#allocation3], %s316_s26, %s316_s26, %s317_s27  }
   0x9   :  { %s47_s8 = sshll.u32 %s319_s1, 4  ;;  %s48_s8 = int_to_ptr.vmem [resolvable:$true] %s47_s8 }
   0xa   :  { %53 = dma.hbm_to_vmem [thread:$0]  %s46_s7, 256, %s48_s8, [#allocation6], %s316_s26, %s316_s26, %s317_s27  }
   0xb   :  { %309 = dma.done.wait [#allocation3], 128  }
   0xc   :  { %310 = vsyncadd [#allocation3], 4294967168 }
   0xd   :  { %311 = dma.done.wait [#allocation6], 512  }
   0xe   :  { %312 = vsyncadd [#allocation6], 4294966784  ;;  %v200_v0 = vld [vmem:[#allocation5 + $0x8] sm:$0xff]  ;;  %v199_v1 = vld [vmem:[#allocation5] sm:$0xff]  ;;  %vm96_vm0 = vcmask 261120   ;;  %s320_s11 = smov [#allocation8]  }
   0xf   :  { %106 = vmatpush.bf16.msra.mxu0 %v200_v0  ;;  %v198_v2 = vld [vmem:[#allocation2] sm:$0xff]  ;;  %v201_v4 = vld [vmem:[#allocation7] sm:$0xff]  ;;  %s160_s12 = sshll.u32 %s320_s11, 4  ;;  %s321_s15 = smov 128   ;;  %s161_s12 = int_to_ptr.vmem [resolvable:$true] %s160_s12 }
  0x10   :  { %v202_v3 = vld [vmem:[#allocation7 + $0x8] sm:$0xff]  ;;  %s322_s16 = smov 8  }
  0x11   :  { %146 = vmatpush.bf16.msra.mxu1 %v202_v3  ;;  %v211_v6 = vld [vmem:[%s373_s2] ss:$0 sm:$0xff]  ;;  %s162_s2 = sshll.u32 %s376_s5, 4  ;;  %s163_s2 = int_to_ptr.hbm [resolvable:$true] %s162_s2 }
  0x12   :  { %v212_v13 = vld [vmem:[%s375_s4] ss:$0 sm:$0xff] }
  0x13   :  { %107 = vmatpush.bf16.msra.mxu0 %v199_v1 }
  0x15   :  { %147 = vmatpush.bf16.msra.mxu1 %v201_v4 }
  0x16   :  { %188 = vmatmul.msk.bf16.vlgmr.msra.gmra.mxu0 %vm96_vm0, %v198_v2 }
  0x93   :  { %v109_v5 = vpop.f32.mrf.mxu0 }
  0x94   :  { %v110_v7 = vadd.f32 %v211_v6, %v109_v5 }
  0x96   :  { %v114_v10 = vmax.f32 %v110_v7, 0.0 }
  0x9b   :  { %v111_v8 = vpop.f32.mrf.mxu0 }
  0x9c   :  { %v112_v9 = vadd.f32 %v211_v6, %v111_v8 }
  0x9e   :  { %v115_v11 = vmax.f32 %v112_v9, 0.0 }
  0xa0   :  { %v116_v12 = vpack.c.bf16 %v115_v11, %v114_v10 }
  0xa2   :  { %197 = vmatmul.msk.bf16.vlgmr.msra.gmra.mxu1 %vm96_vm0, %v116_v12 }
 0x11f   :  { %v149_v14 = vpop.f32.mrf.mxu1 }
 0x120   :  { %v150_v15 = vadd.f32 %v212_v13, %v149_v14 }
 0x122   :  { %154 = vst [vmem:[#allocation8] sm:$0xff] %v150_v15 }
 0x127   :  { %v151_v16 = vpop.f32.mrf.mxu1 }
 0x128   :  { %v152_v17 = vadd.f32 %v212_v13, %v151_v16 }
 0x12a   :  { %155 = vst [vmem:[#allocation8 + $0x8] sm:$0xff] %v152_v17 }
 0x12b   :  { %168 = dma.vmem_to_hbm [thread:$0]  %s161_s12, 256, %s163_s2, [#allocation4], %s321_s15, %s321_s15, %s322_s16  }
 0x12c   :  { %313 = dma.done.wait [#allocation4], 256  }
 0x12d   :  { %314 = vsyncadd [#allocation4], 4294967040 }
 0x12e   :  { %173 = vsyncpa [#allocation3], 1 }
 0x12f   :  { %174 = vsyncpa [#allocation6], 1 }
 0x130   :  { %175 = vsyncpa [#allocation4], 1 }

</bundles_post_ra>
